<compile_context>
chip_gen: v6e
topology: v6e:2x2x1
jax: 0.10.0
libtpu: 0.0.40
codegen_flags: <defaults>
</compile_context>

<pallas_src>
import math
import functools

import jax
import jax.numpy as jnp
from jax.experimental import pallas as pl
from jax.experimental.pallas import tpu as pltpu


def _layernorm_kernel(x_ref, alpha_ref, bias_ref, o_ref, *, eps):
    # x_ref: (TM, D) tile of rows; alpha_ref / bias_ref: (1, D) f32, resident.
    x = x_ref[...].astype(jnp.float32)
    d = x.shape[-1]

    inv_d = jnp.float32(1.0 / d)
    # TODO(synk): D == 1 yields zero variance here instead of torch's NaN (0/0).
    inv_dm1 = jnp.float32(1.0 / max(d - 1, 1))

    # Single pass: two independent row reductions (better overlap with DMA).
    s1 = jnp.sum(x, axis=-1, keepdims=True)          # Σx
    s2 = jnp.sum(x * x, axis=-1, keepdims=True)      # Σx²
    mean = s1 * inv_d
    # Unbiased variance (torch.std default): (Σx² − D·mean²) / (D − 1).
    var = jnp.maximum(s2 - s1 * mean, jnp.float32(0.0)) * inv_dm1
    std = jnp.sqrt(var)

    # Per-row reciprocal (shape (TM, 1)); approx=False keeps full accuracy.
    inv = pl.reciprocal(std + jnp.float32(eps), approx=False)

    alpha = alpha_ref[...]   # already f32
    bias = bias_ref[...]

    out = (x - mean) * inv * alpha + bias
    o_ref[...] = out.astype(o_ref.dtype)


def _round_up(v, m):
    return ((v + m - 1) // m) * m


def layer_norm(x, alpha, bias, eps=1e-6):
    """x: (..., D); alpha, bias: (D,), (1,), or scalar (broadcast over D)."""
    orig_shape = x.shape
    D = orig_shape[-1]
    rows = int(math.prod(orig_shape[:-1])) if len(orig_shape) > 1 else 1
    x2 = x.reshape(rows, D)

    # Params pre-cast to f32 once in the wrapper (kernel never re-casts them).
    alpha2 = jnp.broadcast_to(
        jnp.asarray(alpha, jnp.float32).reshape(-1), (D,)).reshape(1, D)
    bias2 = jnp.broadcast_to(
        jnp.asarray(bias, jnp.float32).reshape(-1), (D,)).reshape(1, D)

    sub = 16 if x2.dtype == jnp.dtype(jnp.bfloat16) else 8   # sublane multiple
    itemsize = jnp.dtype(x2.dtype).itemsize
    row_bytes = max(D * itemsize, 1)

    # --- Per-generation VMEM budget -----------------------------------------
    # Fall back to the smallest VMEM (v7x: 64 MiB/TC) if the query fails.
    try:
        vmem_cap = int(pltpu.get_tpu_info().vmem_capacity_bytes)
    except Exception:
        vmem_cap = 64 * 1024 * 1024

    if vmem_cap >= 128 * 1024 * 1024:            # v5e / v6e
        target_block_bytes = 12 * 1024 * 1024
        vmem_ceiling = 96 * 1024 * 1024
    else:                                        # v7x (or unknown → conservative)
        target_block_bytes = 8 * 1024 * 1024
        vmem_ceiling = 56 * 1024 * 1024

    # --- Row-tile sizing (bytes-based; no hard row cap) ----------------------
    tm = max(sub, (target_block_bytes // row_bytes // sub) * sub)
    tm = min(tm, 8192)

    # Don't over-allocate VMEM for small inputs.
    rows_ceil = _round_up(rows, sub)
    tm = min(tm, rows_ceil)

    # Guarantee >= 2 grid steps (keeps both v7x TensorCores busy); negligible
    # per-step overhead on single-TC chips.
    if tm >= rows and rows >= 2 * sub:
        tm = max(sub, _round_up(pl.cdiv(rows, 2), sub))

    # Partial trailing block is clipped by Pallas: no pad, no post-slice.
    grid = (pl.cdiv(rows, tm),)

    # --- VMEM limit: double-buffered in + out blocks, params, headroom -------
    block_bytes = tm * D * itemsize
    needed = 4 * block_bytes + 4 * D * 4
    vmem_limit = int(min(max(needed + needed // 2, 16 * 1024 * 1024), vmem_ceiling))

    kernel = functools.partial(_layernorm_kernel, eps=eps)

    out = pl.pallas_call(
        kernel,
        out_shape=jax.ShapeDtypeStruct((rows, D), x.dtype),
        grid_spec=pltpu.PrefetchScalarGridSpec(
            num_scalar_prefetch=0,
            grid=grid,
            in_specs=[
                pl.BlockSpec((tm, D), lambda i: (i, 0)),
                pl.BlockSpec((1, D), lambda i: (0, 0)),   # alpha: constant block, stays resident
                pl.BlockSpec((1, D), lambda i: (0, 0)),   # bias
            ],
            out_specs=pl.BlockSpec((tm, D), lambda i: (i, 0)),
        ),
        compiler_params=pltpu.CompilerParams(
            dimension_semantics=("parallel",),
            vmem_limit_bytes=vmem_limit,
        ),
    )(x2, alpha2, bias2)

    return out.reshape(orig_shape)


if __name__ == "__main__":
    key = jax.random.PRNGKey(0)

    batch, seq, hidden = 2, 8, 32

    x = jax.random.normal(key, (batch, seq, hidden), dtype=jnp.float32)

    # Parameter init matching nn.Parameter(torch.ones(dims)) / zeros(dims).
    dims = hidden
    alpha = jnp.ones((dims,), dtype=jnp.float32)
    bias = jnp.zeros((dims,), dtype=jnp.float32)
    eps = 1e-6

    out = layer_norm(x, alpha, bias, eps=eps)
    out = jax.block_until_ready(out)

    # Reference in plain JAX (same semantics as the torch module: unbiased std,
    # eps added to std, not variance).
    mean = jnp.mean(x, axis=-1, keepdims=True)
    std = jnp.sqrt(jnp.sum((x - mean) ** 2, axis=-1, keepdims=True) / (hidden - 1))
    ref = alpha * (x - mean) / (std + eps) + bias

    assert out.shape == x.shape
    assert jnp.allclose(out, ref, atol=1e-5, rtol=1e-5), float(jnp.max(jnp.abs(out - ref)))

    print("KERNEL_OK")
</pallas_src>

<mosaic_0001>
module attributes {stable_mosaic.version = 11 : i64} {
  func.func @_layernorm_kernel(%arg0: i32, %arg1: memref<8x32xf32, #tpu.memory_space<vmem>>, %arg2: memref<1x32xf32, #tpu.memory_space<vmem>>, %arg3: memref<1x32xf32, #tpu.memory_space<vmem>>, %arg4: memref<8x32xf32, #tpu.memory_space<vmem>>) attributes {dimension_semantics = [#tpu.dimension_semantics<parallel>], iteration_bounds = array<i64: 2>, scalar_prefetch = 0 : i64, scratch_operands = 0 : i64, tpu.core_type = #tpu.core_type<tc>, window_params = [{transform_indices = @transform_0, window_bounds = array<i64: 8, 32>}, {pipeline_mode = #tpu.pipeline_mode<synchronous>, transform_indices = @transform_1, window_bounds = array<i64: 1, 32>}, {pipeline_mode = #tpu.pipeline_mode<synchronous>, transform_indices = @transform_2, window_bounds = array<i64: 1, 32>}, {transform_indices = @transform_3, window_bounds = array<i64: 8, 32>}]} {
    %c0 = arith.constant 0 : index
    %c0_0 = arith.constant 0 : index
    %0 = vector.load %arg1[%c0, %c0_0] : memref<8x32xf32, #tpu.memory_space<vmem>>, vector<8x32xf32>
    %cst = arith.constant dense<0.000000e+00> : vector<8xf32>
    %1 = vector.multi_reduction <add>, %0, %cst [1] : vector<8x32xf32> to vector<8xf32>
    %2 = vector.shape_cast %1 : vector<8xf32> to vector<8x1xf32>
    %3 = arith.mulf %0, %0 : vector<8x32xf32>
    %cst_1 = arith.constant dense<0.000000e+00> : vector<8xf32>
    %4 = vector.multi_reduction <add>, %3, %cst_1 [1] : vector<8x32xf32> to vector<8xf32>
    %5 = vector.shape_cast %4 : vector<8xf32> to vector<8x1xf32>
    %cst_2 = arith.constant 3.125000e-02 : f32
    %6 = vector.broadcast %cst_2 : f32 to vector<8x1xf32>
    %7 = arith.mulf %2, %6 : vector<8x1xf32>
    %8 = arith.mulf %2, %7 : vector<8x1xf32>
    %9 = arith.subf %5, %8 : vector<8x1xf32>
    %cst_3 = arith.constant 0.000000e+00 : f32
    %10 = vector.broadcast %cst_3 : f32 to vector<8x1xf32>
    %11 = arith.maximumf %9, %10 : vector<8x1xf32>
    %cst_4 = arith.constant 0.0322580636 : f32
    %12 = vector.broadcast %cst_4 : f32 to vector<8x1xf32>
    %13 = arith.mulf %11, %12 : vector<8x1xf32>
    %14 = math.sqrt %13 : vector<8x1xf32>
    %cst_5 = arith.constant 9.99999997E-7 : f32
    %15 = vector.broadcast %cst_5 : f32 to vector<8x1xf32>
    %16 = arith.addf %14, %15 : vector<8x1xf32>
    %17 = tpu.reciprocal %16 : vector<8x1xf32> -> vector<8x1xf32>
    %c0_6 = arith.constant 0 : index
    %c0_7 = arith.constant 0 : index
    %18 = vector.load %arg2[%c0_6, %c0_7] : memref<1x32xf32, #tpu.memory_space<vmem>>, vector<1x32xf32>
    %c0_8 = arith.constant 0 : index
    %c0_9 = arith.constant 0 : index
    %19 = vector.load %arg3[%c0_8, %c0_9] : memref<1x32xf32, #tpu.memory_space<vmem>>, vector<1x32xf32>
    %20 = vector.broadcast %7 : vector<8x1xf32> to vector<8x32xf32>
    %21 = arith.subf %0, %20 : vector<8x32xf32>
    %22 = vector.broadcast %17 : vector<8x1xf32> to vector<8x32xf32>
    %23 = arith.mulf %21, %22 : vector<8x32xf32>
    %24 = vector.broadcast %18 : vector<1x32xf32> to vector<8x32xf32>
    %25 = arith.mulf %23, %24 : vector<8x32xf32>
    %26 = vector.broadcast %19 : vector<1x32xf32> to vector<8x32xf32>
    %27 = arith.addf %25, %26 : vector<8x32xf32>
    %c0_10 = arith.constant 0 : index
    %c0_11 = arith.constant 0 : index
    %28 = vector.load %arg4[%c0_10, %c0_11] : memref<8x32xf32, #tpu.memory_space<vmem>>, vector<8x32xf32>
    tpu.vector_store %arg4[%c0_10, %c0_11], %27 {strides = array<i32>} : memref<8x32xf32, #tpu.memory_space<vmem>>, vector<8x32xf32>,
    return
  }
  func.func @transform_0(%arg0: i32) -> (i32, i32) {
    %c0_i32 = arith.constant 0 : i32
    %c0_i32_0 = arith.constant 0 : i32
    return %arg0, %c0_i32 : i32, i32
  }
  func.func @transform_1(%arg0: i32) -> (i32, i32) {
    %c0_i32 = arith.constant 0 : i32
    %c0_i32_0 = arith.constant 0 : i32
    %c0_i32_1 = arith.constant 0 : i32
    return %c0_i32, %c0_i32_0 : i32, i32
  }
  func.func @transform_2(%arg0: i32) -> (i32, i32) {
    %c0_i32 = arith.constant 0 : i32
    %c0_i32_0 = arith.constant 0 : i32
    %c0_i32_1 = arith.constant 0 : i32
    return %c0_i32, %c0_i32_0 : i32, i32
  }
  func.func @transform_3(%arg0: i32) -> (i32, i32) {
    %c0_i32 = arith.constant 0 : i32
    %c0_i32_0 = arith.constant 0 : i32
    return %arg0, %c0_i32 : i32, i32
  }
}

</mosaic_0001>

<bundles_post_ra>
// kernel: tpu_custom_call.1
= control target key start
LH: loop header
LB: loop body
LE: loop exit
PB: predicated region body
PF: predicated region fallthrough
CT: control target
= control target key end

     0   :  { %8 = vsyncpa [#allocation3], 0  ;;  %s646_s0 = inlined_call_operand.hbm [shape: f32[16,32], index: 0, kind: input, shape index: {}]   ;;  %s647_s1 = inlined_call_operand.vmem [shape: f32[1,32], index: 1, kind: input, shape index: {}]   ;;  %s648_s2 = inlined_call_operand.vmem [shape: f32[1,32], index: 2, kind: input, shape index: {}]   ;;  %s649_s3 = inlined_call_operand.hbm [shape: f32[16,32], index: 3, kind: output, shape index: {}]  }
   0x1   :  { %10 = vsyncpa [#allocation3 + $0x1], 0 }
   0x2   :  { %11 = vsyncpa [#allocation4], 0 }
   0x3   :  { %13 = vsyncpa [#allocation4 + $0x1], 0  ;;  %s492_s12 = smov 0   ;;  %s494_s13 = smov 0  }
   0x4   :  { %s496_s14 = smov 0   ;;  %s498_s15 = smov 0  }
   0x5 LB: > { %s513_s16 = sadd.s32 4294967295, %s468_s15   ;;  %s312_s17 = sadd.s32 4294967294, %s468_s15   ;;  %s468_s15 = sphi %s498_s15, %s666_s15   ;;  %s464_s14 = sphi %s496_s14, %s665_s14   ;;  %s460_s13 = sphi %s494_s13, %s664_s13   ;;  %s456_s12 = sphi %s492_s12, %s663_s12  }
   0x6   : > { %s517_s18 = sadd.s32 1, %s468_s15   ;;  %s26_s19 = sadd.s32 1, %s464_s14 }
   0x7   : > { %s23_s20 = ssub.s32 %s468_s15, %s517_s18  ;;  %p33_p0 = scmp.ne.s32.totalorder %s464_s14, %s460_s13 }
   0x8   : > { %p24_p1 = scmp.eq.s32.totalorder %s23_s20, 0  ;;  %p34_p2 = scmp.eq.s32.totalorder %s468_s15, 0 }
   0x9   : > { %p39_p3 = scmp.ne.s32.totalorder %s460_s13, %s456_s12  ;;  %p40_p4 = scmp.eq.s32.totalorder %s513_s16, 0 }
   0xa   : > { %s529_s21 = scalar_select %p24_p1, %s464_s14, %s26_s19  }
   0xb   : > { %p531_p5 = por %p34_p2, %p33_p0  ;;  %p535_p6 = por %p40_p4, %p39_p3 }
   0xc   : > { %p105_p7 = scmp.eq.s32.totalorder %s513_s16, 1  ;;  %p111_p8 = scmp.eq.s32.totalorder %s312_s17, 1 }
   0xd   : > { %s653_s23 = scalar_select %p535_p6, 1, 0 }
   0xe   : > { %p338_p10 = scmp.lt.s32.totalorder %s468_s15, 2  ;;  %p542_p11 = por %p105_p7, %p33_p0 }
   0xf   : > { %p546_p12 = por %p111_p8, %p39_p3  ;;  %s137_s26 = sand.u32 1, %s464_s14  }
  0x10   : > { %s654_s24 = scalar_select %p542_p11, 1, 0 }
  0x11   : > { %s655_s25 = scalar_select %p546_p12, 1, 0 }
  0x12   : > { %s316_s27 = sshll.u32 %s468_s15, 7  ;;  %s315_s28 = sshll.u32 %s137_s26, 3 }
  0x13   : > { %s555_s4 = scalar_lea.hbm %s646_s0, %s316_s27  ;;  %s141_s5 = scalar_lea.vmem [#allocation2], %s315_s28 }
  0x14   : > { %s148_s6 = sshll.u32 %s141_s5, 4  ;;  %p559_p13 = pnand %p338_p10, %p531_p5  ;;  %s563_s6 = int_to_ptr.vmem [resolvable:$true] %s148_s6 }
  0x15   : > { %s138_s8 = scalar_lea.sflag [#allocation3], %s137_s26  ;;  %s376_s9 = scalar_lea.hbm %s555_s4, 128 }
  0x16   : > { %p377_p2 = scmp.ne.s32.totalorder %s555_s4, %s376_s9  ;;  %p378_p3 = pneg %p559_p13 }
  0x17   : > { %s381_s17 = scalar_lea.hbm %s646_s0, 256  ;;  %p382_p5 = scmp.lt.s32.totalorder %s555_s4, %s646_s0 }
  0x18   : > { %p379_p4 = pnand %p378_p3, %p377_p2  ;;  %p383_p8 = scmp.lt.s32.totalorder %s381_s17, %s376_s9 }
  0x1a   : > { %p380_p7 = pneg %p379_p4  ;;  %p384_p10 = por %p383_p8, %p382_p5 }
  0x1c   : > { %p385_p9 = pnand %p384_p10, %p380_p7 }
  0x1e   : > { %388 = shalt.err (!%p385_p9)
}
  0x1f   : > { %s389_s22 = scalar_lea.vmem %s563_s6, 128  ;;  %s470_s26 = smov [#allocation2]  }
  0x20   : > { %p390_p0 = scmp.ne.s32.totalorder %s563_s6, %s389_s22  ;;  %s394_s27 = sshll.u32 %s470_s26, 4  ;;  %s395_s27 = int_to_ptr.vmem [resolvable:$false] %s394_s27 }
  0x21   : > { %s396_s28 = scalar_lea.vmem %s395_s27, 256  ;;  %p397_p4 = scmp.lt.s32.totalorder %s563_s6, %s395_s27 }
  0x22   : > { %p392_p1 = pnand %p390_p0, %p378_p3  ;;  %p398_p12 = scmp.lt.s32.totalorder %s396_s28, %s389_s22 }
  0x24   : > { %p393_p2 = pneg %p392_p1  ;;  %p399_p11 = por %p398_p12, %p397_p4 }
  0x26   : > { %p400_p6 = pnand %p399_p11, %p393_p2 }
  0x28   : > { %403 = shalt.err (!%p400_p6)
}
  0x29   : > { %333 = dma.hbm_to_vmem [thread:$0]  (!%p559_p13), %s555_s4, 128, %s563_s6, %s138_s8  }
  0x2a   : > { %p657_p9 = scmp.lt.s32.totalorder %s468_s15, 3  ;;  %p658_p7 = scmp.ge.s32.totalorder %s468_s15, 1 }
  0x2c   : > { %p154_p0 = pnand %p658_p7, %p657_p9 }
  0x2d   : > { %s590_s29 = sand.u32 (!%p154_p0), 1, %s460_s13   ;;  %p659_p6 = scmp.ne.s32.totalorder (!%p154_p0), %s653_s23, 0 }
  0x2e   : > { %157 = sbr.rel (%p154_p0) target bundleno = 255 (0xff), region = 32  ;;  %s318_s30 = sshll.u32 (!%p154_p0), %s590_s29, 3 }
  0x2f   : > { %s160_s5 = scalar_lea.sflag (!%p154_p0), [#allocation3], %s590_s29  ;;  %s163_s7 = scalar_lea.vmem (!%p154_p0), [#allocation2], %s318_s30 }
  0x33   : > { %447 = dma.done.wait (%p659_p6), %s160_s5, 128  }
  0x34   : > { %449 = vsyncadd (%p659_p6), %s160_s5, 4294967168  ;;  %vm187_vm0 = vcmask 261120   ;;  %v186_v0 = vld [vmem:[%s163_s7] sm:$0xff]  ;;  %s323_s9 = sshll.u32 %s513_s16, 7  ;;  %s185_s10 = scalar_lea.vmem [#allocation5], %s318_s30 }
  0x35   : > { %v188_v1 = vsel %vm187_vm0, %v186_v0, 0.0  ;;  %v191_v2 = vmul.f32 %v186_v0, %v186_v0  ;;  %v320_v19 = vld [vmem:[%s647_s1] ss:$0 sm:$0xff]  ;;  %s242_s11 = sshll.u32 %s185_s10, 4  ;;  %s240_s20 = scalar_lea.hbm %s649_s3, %s323_s9  ;;  %s243_s11 = int_to_ptr.vmem [resolvable:$true] %s242_s11 }
  0x36   : > { %189 = vadd.xlane.f32.xlu0 %v188_v1  ;;  %v321_v21 = vld [vmem:[%s648_s2] ss:$0 sm:$0xff]  ;;  %s229_s22 = scalar_lea.sflag [#allocation4], %s590_s29  ;;  %s404_s26 = scalar_lea.vmem %s243_s11, 128 }
  0x37   : > { %v192_v3 = vsel %vm187_vm0, %v191_v2, 0.0  ;;  %p405_p11 = scmp.ne.s32.totalorder %s243_s11, %s404_s26  ;;  %p660_p12 = scmp.ne.s32.totalorder %s654_s24, 0 }
  0x38   : > { %s471_s27 = smov [#allocation5]  }
  0x39   : > { %p406_p13 = pnand %p405_p11, %p660_p12  ;;  %s408_s16 = sshll.u32 %s471_s27, 4  ;;  %s409_s16 = int_to_ptr.vmem [resolvable:$false] %s408_s16 }
  0x3a   : > { %193 = vadd.xlane.f32.xlu0 %v192_v3  ;;  %s410_s28 = scalar_lea.vmem %s409_s16, 256  ;;  %p411_p3 = scmp.lt.s32.totalorder %s243_s11, %s409_s16 }
  0x3b   : > { %p407_p1 = pneg %p406_p13  ;;  %p412_p5 = scmp.lt.s32.totalorder %s410_s28, %s404_s26 }
  0x3d   : > { %p413_p8 = por %p412_p5, %p411_p3 }
  0x3f   : > { %p414_p10 = pnand %p413_p8, %p407_p1 }
  0xbf   : > { %v190_v4 = vpop.xlane.xlu0 %189 }
  0xc0   : > { %v195_v5 = vmul.f32 0.03125, %v190_v4 }
  0xc2   : > { %v196_v6 = vmul.f32 %v195_v5, %v190_v4  ;;  %v211_v17 = vsub.f32 %v186_v0, %v195_v5 }
  0xc3   : > { %v194_v7 = vpop.xlane.xlu0 %193 }
  0xc4   : > { %v197_v8 = vsub.f32 %v194_v7, %v196_v6 }
  0xc6   : > { %v198_v9 = vmax.f32 %v197_v8, 0.0 }
  0xc8   : > { %v199_v10 = vmul.f32 0.032258064, %v198_v9 }
  0xca   : > { %372 = vrsqrt.f32 %v199_v10  ;;  %vm202_vm1 = vcmp.eq.f32.partialorder %v199_v10, inf  ;;  %v205_v13 = vand.u32 2147483648, %v199_v10  ;;  %vm204_vm2 = vcmp.eq.f32.partialorder %v199_v10, 0.0 }
  0xd7   : > { %v373_v11 = vpop.eup %372 }
  0xd8   : > { %v201_v12 = vmul.f32 %v373_v11, %v199_v10 }
  0xda   : > { %v203_v14 = vsel %vm202_vm1, %v199_v10, %v201_v12 }
  0xdb   : > { %v206_v15 = vsel %vm204_vm2, %v205_v13, %v203_v14 }
  0xdc   : > { %v207_v16 = vadd.f32 1e-06, %v206_v15 }
  0xde   : > { %374 = vrcp.f32 %v207_v16 }
  0xeb   : > { %v375_v18 = vpop.eup %374 }
  0xec   : > { %v212_v20 = vmul.f32 %v375_v18, %v211_v17 }
  0xee   : > { %v219_v22 = vmul.f32 %v320_v19, %v212_v20 }
  0xf0   : > { %v226_v23 = vadd.f32 %v321_v21, %v219_v22 }
  0xf2   : > { %227 = vst.msk [vmem:[%s185_s10] sm:$0xff] %vm187_vm0, %v226_v23 }
  0xf3   : > { %417 = shalt.err (!%p414_p10)
}
  0xf4   : > { %s418_s30 = scalar_lea.hbm %s240_s20, 128  ;;  %s422_s7 = scalar_lea.hbm %s649_s3, 256 }
  0xf5   : > { %p419_p2 = scmp.ne.s32.totalorder %s240_s20, %s418_s30  ;;  %p423_p7 = scmp.lt.s32.totalorder %s240_s20, %s649_s3 }
  0xf6   : > { %p424_p0 = scmp.lt.s32.totalorder %s422_s7, %s418_s30 }
  0xf7   : > { %p420_p4 = pnand %p419_p2, %p660_p12 }
  0xf8   : > { %p425_p6 = por %p424_p0, %p423_p7 }
  0xf9   : > { %p421_p9 = pneg %p420_p4 }
  0xfb   : > { %p426_p11 = pnand %p425_p6, %p421_p9 }
  0xfd   : > { %429 = shalt.err (!%p426_p11)
}
  0xfe   : > { %328 = dma.vmem_to_hbm [thread:$0]  (%p660_p12), %s243_s11, 128, %s240_s20, %s229_s22  }
  0xff PF: > { %s254_s6 = sand.u32 1, %s456_s12   ;;  %p661_p13 = scmp.ne.s32.totalorder %s655_s25, 0 }
 0x100   : > { %p662_p1 = scmp.ge.s32.totalorder %s468_s15, 2  ;;  %s255_s8 = scalar_lea.sflag [#allocation4], %s254_s6 }
 0x102   : > { %p335_p3 = pnand %p662_p1, %p661_p13 }
 0x104   : > { %p336_p5 = pneg %p335_p3 }
 0x106   : > { %451 = dma.done.wait (%p336_p5), %s255_s8, 128  }
 0x107   : > { %453 = vsyncadd (%p336_p5), %s255_s8, 4294967168  ;;  %p16_p8 = scmp.ge.s32.totalorder %s517_s18, 4   ;;  %s663_s12 = smov %s460_s13 }
 0x108   : > { %s664_s13 = smov %s464_s14  ;;  %s665_s14 = smov %s529_s21 }
 0x109   : > { %s666_s15 = smov %s517_s18  ;;  %18 = sbr.rel (!%p16_p8) target bundleno = 5 (0x5), region = 77 }
 0x10e   :  { %260 = vsyncpa [#allocation3], 1 }
 0x10f   :  { %262 = vsyncpa [#allocation3 + $0x1], 1 }
 0x110   :  { %263 = vsyncpa [#allocation4], 1 }
 0x111   :  { %265 = vsyncpa [#allocation4 + $0x1], 1 }

</bundles_post_ra>
